<compile_context>
chip_gen: v7x
topology: tpu7x:2x2x1
jax: 0.10.0
libtpu: 0.0.40
codegen_flags: <defaults>
</compile_context>

<pallas_src>
import math
import numpy as np
import jax
import jax.numpy as jnp
from jax import lax
from jax.experimental import pallas as pl
from jax.experimental.pallas import tpu as pltpu

# ---- torchaudio.transforms.MFCC(n_mfcc=13, sample_rate=16000) defaults ----
SAMPLE_RATE = 16000
N_FFT = 400
WIN_LENGTH = 400
HOP_LENGTH = 200
N_MELS = 128
N_MFCC = 13
N_FREQS = N_FFT // 2 + 1          # 201
FREQ_PAD = 256                    # 201 padded up to 2x128 lane tiles
F_MIN = 0.0
F_MAX = SAMPLE_RATE / 2.0
TOP_DB = 80.0
AMIN = 1e-10
EPS = 1e-9
LOG10_INV = 1.0 / math.log(10.0)


# ----------------------------- parameter setup (host) -----------------------------
def _hann_window(n):
    i = np.arange(n)
    return 0.5 - 0.5 * np.cos(2.0 * np.pi * i / n)   # torch.hann_window(periodic=True)


def _dft_weights():
    """Fused (cos | sin) windowed-DFT matrix, (N_FFT, 2*FREQ_PAD), zero-padded cols."""
    win = _hann_window(WIN_LENGTH)
    n = np.arange(N_FFT)[:, None].astype(np.float64)
    k = np.arange(N_FREQS)[None, :].astype(np.float64)
    ang = 2.0 * np.pi * n * k / N_FFT
    cosw = np.zeros((N_FFT, FREQ_PAD), np.float32)
    sinw = np.zeros((N_FFT, FREQ_PAD), np.float32)
    cosw[:, :N_FREQS] = (win[:, None] * np.cos(ang)).astype(np.float32)
    sinw[:, :N_FREQS] = (win[:, None] * np.sin(ang)).astype(np.float32)
    return np.concatenate([cosw, sinw], axis=1)      # (400, 512)


def _mel_weights():
    """torchaudio melscale_fbanks (htk, norm=None), zero-padded rows to FREQ_PAD."""
    all_freqs = np.linspace(0, SAMPLE_RATE // 2, N_FREQS)
    hz2mel = lambda f: 2595.0 * np.log10(1.0 + f / 700.0)
    mel2hz = lambda m: 700.0 * (10.0 ** (m / 2595.0) - 1.0)
    m_pts = np.linspace(hz2mel(F_MIN), hz2mel(F_MAX), N_MELS + 2)
    f_pts = mel2hz(m_pts)
    f_diff = f_pts[1:] - f_pts[:-1]
    slopes = f_pts[None, :] - all_freqs[:, None]
    down = -slopes[:, :-2] / f_diff[:-1]
    up = slopes[:, 2:] / f_diff[1:]
    fb = np.maximum(0.0, np.minimum(down, up))
    out = np.zeros((FREQ_PAD, N_MELS), np.float32)
    out[:N_FREQS, :] = fb.astype(np.float32)
    return out                                        # (256, 128)


def _dct_weights():
    """Ortho DCT-II in (n_mfcc, n_mels) layout, i.e. transposed create_dct."""
    m = np.arange(N_MELS)[None, :].astype(np.float64)
    f = np.arange(N_MFCC)[:, None].astype(np.float64)
    mat = np.cos(np.pi / N_MELS * (m + 0.5) * f) * np.sqrt(2.0 / N_MELS)
    mat[0] *= 1.0 / np.sqrt(2.0)
    return mat.astype(np.float32)                     # (13, 128)


def _round_up(x, m):
    return ((x + m - 1) // m) * m


# --------------------------------- Pallas kernels ---------------------------------
def logmel_kernel(frames_ref, dftw_ref, mel_ref, out_ref):
    # frames_ref: (TILE_M, N_FFT) bf16 windowless frames
    # dftw_ref:   (N_FFT, 2*FREQ_PAD) bf16 (Hann-windowed cos | sin, zero-padded cols)
    # mel_ref:    (FREQ_PAD, N_MELS) f32
    # out_ref:    (TILE_M, N_MELS) f32  -> unclamped log-mel dB, lane-dense (128 wide)
    spec = jnp.dot(frames_ref[...], dftw_ref[...],
                   preferred_element_type=jnp.float32)            # (TILE_M, 512)
    re = spec[:, :FREQ_PAD]
    im = spec[:, FREQ_PAD:]
    power = re * re + im * im                                     # |STFT|^2 (padded cols = 0)
    mel = jnp.dot(power, mel_ref[...],
                  preferred_element_type=jnp.float32)             # (TILE_M, 128)
    # amplitude_to_DB (power): 10*log10(clamp(x, amin)), db_multiplier = 0
    out_ref[...] = (10.0 * LOG10_INV) * jnp.log(jnp.maximum(mel, AMIN))


def _delta(x):
    """torchaudio compute_deltas (win_length=5, replicate pad) along the last axis."""
    tdim = x.shape[-1]
    first = x[:, 0:1]
    last = x[:, tdim - 1:tdim]

    def shifted(k):
        # y[:, i] = x[:, clip(i + k, 0, tdim - 1)]
        if k > 0:
            pad = jnp.broadcast_to(last, (x.shape[0], k))
            return jnp.concatenate([x[:, k:], pad], axis=-1)
        kk = -k
        pad = jnp.broadcast_to(first, (x.shape[0], kk))
        return jnp.concatenate([pad, x[:, :tdim - kk]], axis=-1)

    # denom = n(n+1)(2n+1)/3 with n=2 -> 10
    return (1.0 * (shifted(1) - shifted(-1)) + 2.0 * (shifted(2) - shifted(-2))) * 0.1


def make_feature_kernel(batch, t):
    def feature_kernel(logmel_ref, dct_ref, out_ref):
        # logmel_ref: (n_rows_pad, N_MELS) f32, rows [b*t:(b+1)*t] belong to batch b
        # dct_ref:    (N_MFCC, N_MELS) f32
        # out_ref:    (batch, N_MFCC, 3*t) f32  (torch layout, time on lanes)
        dct = dct_ref[...]

        dbs = [logmel_ref[pl.ds(bi * t, t), :] for bi in range(batch)]   # (t, 128) each
        # top_db clamp: torchaudio uses one max over the whole 3-D (B, n_mels, T) tensor.
        db_max = dbs[0].max()
        for bi in range(1, batch):
            db_max = jnp.maximum(db_max, dbs[bi].max())
        floor = db_max - TOP_DB

        feats = []
        for bi in range(batch):
            db_c = jnp.maximum(dbs[bi], floor)                           # (t, 128)
            # mfcc[f, tt] = sum_m dct[f, m] * db_c[tt, m]   (time on lanes)
            mf = lax.dot_general(dct, db_c, (((1,), (1,)), ((), ())),
                                 preferred_element_type=jnp.float32)     # (13, t)
            d1 = _delta(mf)                                              # deltas
            d2 = _delta(d1)                                              # delta-deltas
            feats.append(jnp.concatenate([mf, d1, d2], axis=-1))         # (13, 3t)

        # mean / std(unbiased=False) over the batch dimension, then normalize.
        inv_b = 1.0 / float(batch)
        mean = feats[0]
        for bi in range(1, batch):
            mean = mean + feats[bi]
        mean = mean * inv_b
        var = (feats[0] - mean) ** 2
        for bi in range(1, batch):
            var = var + (feats[bi] - mean) ** 2
        var = var * inv_b
        denom = jnp.sqrt(var) + EPS
        for bi in range(batch):
            out_ref[bi] = (feats[bi] - mean) / denom

    return feature_kernel


# ----------------------------------- wrapper ---------------------------------------
def mfcc_transform(waveform):
    """waveform: (B, n_samples) float32 -> (B, n_mfcc, 3 * n_frames) float32."""
    b, n_samples = waveform.shape
    waveform = waveform.astype(jnp.float32)

    # center=True reflect padding + frame extraction (glue).
    # TODO(synk): build the overlapping frames inside the kernel from the contiguous
    # padded waveform to remove the 2x duplicated HBM stream created by this gather.
    pad = N_FFT // 2
    padded = jnp.pad(waveform, ((0, 0), (pad, pad)), mode="reflect")
    n_frames = 1 + (padded.shape[1] - N_FFT) // HOP_LENGTH
    idx = np.arange(n_frames)[:, None] * HOP_LENGTH + np.arange(N_FFT)[None, :]
    frames = padded[:, idx].reshape(b * n_frames, N_FFT).astype(jnp.bfloat16)

    n_rows = b * n_frames
    tile_m = min(512, _round_up(n_rows, 8))          # row tile (<= 512, mult of 8)
    n_rows_pad = _round_up(n_rows, tile_m)
    if n_rows_pad != n_rows:
        frames = jnp.pad(frames, ((0, n_rows_pad - n_rows), (0, 0)))

    dftw = jnp.asarray(_dft_weights(), dtype=jnp.bfloat16)   # (400, 512), VMEM-resident
    melfb = jnp.asarray(_mel_weights())                       # (256, 128), VMEM-resident
    dct = jnp.asarray(_dct_weights())                         # (13, 128)

    # --- kernel A: frames -> log-mel dB, tiled over rows, pipelined + megacore ---
    logmel = pl.pallas_call(
        logmel_kernel,
        out_shape=jax.ShapeDtypeStruct((n_rows_pad, N_MELS), jnp.float32),
        grid=(n_rows_pad // tile_m,),
        in_specs=[
            pl.BlockSpec((tile_m, N_FFT), lambda i: (i, 0)),
            pl.BlockSpec((N_FFT, 2 * FREQ_PAD), lambda i: (0, 0)),   # resident constant
            pl.BlockSpec((FREQ_PAD, N_MELS), lambda i: (0, 0)),      # resident constant
        ],
        out_specs=pl.BlockSpec((tile_m, N_MELS), lambda i: (i, 0)),
        compiler_params=pltpu.CompilerParams(
            dimension_semantics=("parallel",),
            vmem_limit_bytes=48 * 1024 * 1024,
        ),
    )(frames, dftw, melfb)

    # --- kernel B: top_db clamp + DCT + 5-tap deltas + cross-batch normalization ---
    feat = pl.pallas_call(
        make_feature_kernel(b, n_frames),
        out_shape=jax.ShapeDtypeStruct((b, N_MFCC, 3 * n_frames), jnp.float32),
        grid=(1,),
        in_specs=[
            pl.BlockSpec((n_rows_pad, N_MELS), lambda i: (0, 0)),
            pl.BlockSpec((N_MFCC, N_MELS), lambda i: (0, 0)),
        ],
        out_specs=pl.BlockSpec((b, N_MFCC, 3 * n_frames), lambda i: (0, 0, 0)),
        compiler_params=pltpu.CompilerParams(
            vmem_limit_bytes=48 * 1024 * 1024,
        ),
    )(logmel, dct)

    return feat   # (B, n_mfcc, 3 * n_frames), already in torch layout


if __name__ == "__main__":
    key = jax.random.PRNGKey(0)
    B = 2
    N_SAMPLES = 1600   # -> 9 STFT frames with n_fft=400, hop=200, center=True
    waveform = jax.random.normal(key, (B, N_SAMPLES), dtype=jnp.float32)

    out = jax.block_until_ready(mfcc_transform(waveform))

    n_frames = 1 + N_SAMPLES // HOP_LENGTH
    assert out.shape == (B, N_MFCC, 3 * n_frames), out.shape
    assert out.dtype == jnp.float32
    assert bool(jnp.all(jnp.isfinite(out)))
    print("KERNEL_OK")
</pallas_src>

<mosaic_0001>
module attributes {stable_mosaic.version = 11 : i64} {
  func.func @logmel_kernel(%arg0: i32, %arg1: memref<24x400xbf16, #tpu.memory_space<vmem>>, %arg2: memref<400x512xbf16, #tpu.memory_space<vmem>>, %arg3: memref<256x128xf32, #tpu.memory_space<vmem>>, %arg4: memref<24x128xf32, #tpu.memory_space<vmem>>) attributes {dimension_semantics = [#tpu.dimension_semantics<parallel>], iteration_bounds = array<i64: 1>, scalar_prefetch = 0 : i64, scratch_operands = 0 : i64, tpu.core_type = #tpu.core_type<tc>, window_params = [{transform_indices = @transform_0, window_bounds = array<i64: 24, 400>}, {pipeline_mode = #tpu.pipeline_mode<synchronous>, transform_indices = @transform_1, window_bounds = array<i64: 400, 512>}, {pipeline_mode = #tpu.pipeline_mode<synchronous>, transform_indices = @transform_2, window_bounds = array<i64: 256, 128>}, {transform_indices = @transform_3, window_bounds = array<i64: 24, 128>}]} {
    %c0 = arith.constant 0 : index
    %c0_0 = arith.constant 0 : index
    %0 = vector.load %arg1[%c0, %c0_0] : memref<24x400xbf16, #tpu.memory_space<vmem>>, vector<24x400xbf16>
    %c0_1 = arith.constant 0 : index
    %c0_2 = arith.constant 0 : index
    %1 = vector.load %arg2[%c0_1, %c0_2] : memref<400x512xbf16, #tpu.memory_space<vmem>>, vector<400x512xbf16>
    %cst = arith.constant dense<0.000000e+00> : vector<24x512xf32>
    %2 = tpu.matmul %0, %1, %cst {dimension_numbers = #tpu.dot_dimension_numbers<[1], [0], [0], [1], [0, 0, 1, 1], [], []>} : vector<24x400xbf16>, vector<400x512xbf16>, vector<24x512xf32> -> vector<24x512xf32>
    %3 = vector.extract_strided_slice %2 {offsets = [0, 0], sizes = [24, 256], strides = [1, 1]} : vector<24x512xf32> to vector<24x256xf32>
    %4 = vector.extract_strided_slice %2 {offsets = [0, 256], sizes = [24, 256], strides = [1, 1]} : vector<24x512xf32> to vector<24x256xf32>
    %5 = arith.mulf %3, %3 : vector<24x256xf32>
    %6 = arith.mulf %4, %4 : vector<24x256xf32>
    %7 = arith.addf %5, %6 : vector<24x256xf32>
    %c0_3 = arith.constant 0 : index
    %c0_4 = arith.constant 0 : index
    %8 = vector.load %arg3[%c0_3, %c0_4] : memref<256x128xf32, #tpu.memory_space<vmem>>, vector<256x128xf32>
    %cst_5 = arith.constant dense<0.000000e+00> : vector<24x128xf32>
    %9 = tpu.matmul %7, %8, %cst_5 {dimension_numbers = #tpu.dot_dimension_numbers<[1], [0], [0], [1], [0, 0, 1, 1], [], []>} : vector<24x256xf32>, vector<256x128xf32>, vector<24x128xf32> -> vector<24x128xf32>
    %cst_6 = arith.constant 1.000000e-10 : f32
    %10 = vector.broadcast %cst_6 : f32 to vector<24x128xf32>
    %11 = arith.maximumf %9, %10 : vector<24x128xf32>
    %12 = math.log %11 : vector<24x128xf32>
    %cst_7 = arith.constant 4.34294462 : f32
    %13 = vector.broadcast %cst_7 : f32 to vector<24x128xf32>
    %14 = arith.mulf %13, %12 : vector<24x128xf32>
    %c0_8 = arith.constant 0 : index
    %c0_9 = arith.constant 0 : index
    %15 = vector.load %arg4[%c0_8, %c0_9] : memref<24x128xf32, #tpu.memory_space<vmem>>, vector<24x128xf32>
    tpu.vector_store %arg4[%c0_8, %c0_9], %14 {strides = array<i32>} : memref<24x128xf32, #tpu.memory_space<vmem>>, vector<24x128xf32>,
    return
  }
  func.func @transform_0(%arg0: i32) -> (i32, i32) {
    %c0_i32 = arith.constant 0 : i32
    %c0_i32_0 = arith.constant 0 : i32
    return %arg0, %c0_i32 : i32, i32
  }
  func.func @transform_1(%arg0: i32) -> (i32, i32) {
    %c0_i32 = arith.constant 0 : i32
    %c0_i32_0 = arith.constant 0 : i32
    %c0_i32_1 = arith.constant 0 : i32
    return %c0_i32, %c0_i32_0 : i32, i32
  }
  func.func @transform_2(%arg0: i32) -> (i32, i32) {
    %c0_i32 = arith.constant 0 : i32
    %c0_i32_0 = arith.constant 0 : i32
    %c0_i32_1 = arith.constant 0 : i32
    return %c0_i32, %c0_i32_0 : i32, i32
  }
  func.func @transform_3(%arg0: i32) -> (i32, i32) {
    %c0_i32 = arith.constant 0 : i32
    %c0_i32_0 = arith.constant 0 : i32
    return %arg0, %c0_i32 : i32, i32
  }
}

</mosaic_0001>

<bundles_post_ra>
// kernel: tpu_custom_call.1
= control target key start
LH: loop header
LB: loop body
LE: loop exit
PB: predicated region body
PF: predicated region fallthrough
CT: control target
= control target key end

     0   :  { %8 = vsyncpa [#allocation3], 0  ;;  %s1647_s0 = inlined_call_operand.hbm [shape: bf16[24,400], index: 0, kind: input, shape index: {}]   ;;  %s1648_s1 = inlined_call_operand.hbm [shape: bf16[400,512], index: 1, kind: input, shape index: {}]   ;;  %s1649_s2 = inlined_call_operand.hbm [shape: f32[256,128], index: 2, kind: input, shape index: {}]   ;;  %s1650_s3 = inlined_call_operand.hbm [shape: f32[24,128], index: 3, kind: output, shape index: {}]  }
   0x1   :  { %9 = vsyncpa [#allocation6], 0 }
   0x2   :  { %10 = vsyncpa [#allocation4], 0  ;;  %s1554_s12 = smov [#allocation5]   ;;  %s1555_s14 = smov [#allocation2]  }
   0x3   :  { %s28_s13 = sshll.u32 %s1554_s12, 4  ;;  %s16_s15 = sshll.u32 %s1555_s14, 4  ;;  %s29_s13 = int_to_ptr.vmem [resolvable:$true] %s28_s13  ;;  %s1582_s15 = int_to_ptr.vmem [resolvable:$true] %s16_s15 }
   0x4   :  { %s1460_s18 = scalar_lea.hbm %s1648_s1, 12800 }
   0x5   :  { %p1461_p0 = scmp.ne.s32.totalorder %s1648_s1, %s1460_s18  ;;  %p1464_p1 = scmp.lt.u32.totalorder %s1460_s18, %s1648_s1 }
   0x7   :  { %p1466_p2 = pnand %p1464_p1, %p1461_p0 }
   0x9   :  { %1469 = shalt.err (!%p1466_p2)
}
   0xa   :  { %s1470_s23 = scalar_lea.vmem %s29_s13, 12800  ;;  %p1475_p4 = scmp.lt.s32.totalorder %s29_s13, %s29_s13 }
   0xb   :  { %p1471_p3 = scmp.ne.s32.totalorder %s29_s13, %s1470_s23  ;;  %p1476_p5 = scmp.lt.s32.totalorder %s1470_s23, %s1470_s23 }
   0xd   :  { %p1477_p6 = por %p1476_p5, %p1475_p4 }
   0xf   :  { %p1478_p7 = pnand %p1477_p6, %p1471_p3 }
  0x11   :  { %1481 = shalt.err (!%p1478_p7)
}
  0x12   :  { %s1556_s24 = smov 256   ;;  %s1557_s25 = smov 16  }
  0x13   :  { %34 = dma.hbm_to_vmem [thread:$0]  %s1648_s1, 12800, %s29_s13, [#allocation6], %s1556_s24, %s1556_s24, %s1557_s25  }
  0x14   :  { %s1482_s30 = scalar_lea.hbm %s1647_s0, 768 }
  0x15   :  { %p1483_p8 = scmp.ne.s32.totalorder %s1647_s0, %s1482_s30  ;;  %p1486_p9 = scmp.lt.u32.totalorder %s1482_s30, %s1647_s0 }
  0x17   :  { %p1488_p10 = pnand %p1486_p9, %p1483_p8 }
  0x19   :  { %1491 = shalt.err (!%p1488_p10)
}
  0x1a   :  { %s1492_s8 = scalar_lea.vmem %s1582_s15, 768  ;;  %p1497_p12 = scmp.lt.s32.totalorder %s1582_s15, %s1582_s15 }
  0x1b   :  { %p1493_p11 = scmp.ne.s32.totalorder %s1582_s15, %s1492_s8  ;;  %p1498_p13 = scmp.lt.s32.totalorder %s1492_s8, %s1492_s8 }
  0x1d   :  { %p1499_p0 = por %p1498_p13, %p1497_p12 }
  0x1f   :  { %p1500_p1 = pnand %p1499_p0, %p1493_p11 }
  0x21   :  { %1503 = shalt.err (!%p1500_p1)
}
  0x22   :  { %22 = dma.hbm_to_vmem [thread:$0]  %s1647_s0, 768, %s1582_s15, [#allocation3], %s1556_s24, %s1556_s24, %s1557_s25  }
  0x23   :  { %s1558_s10 = smov [#allocation7]   ;;  %s1504_s14 = scalar_lea.hbm %s1649_s2, 4096 }
  0x24   :  { %s40_s11 = sshll.u32 %s1558_s10, 4  ;;  %p1505_p2 = scmp.ne.s32.totalorder %s1649_s2, %s1504_s14  ;;  %s41_s11 = int_to_ptr.vmem [resolvable:$true] %s40_s11 }
  0x25   :  { %p1508_p3 = scmp.lt.u32.totalorder %s1504_s14, %s1649_s2 }
  0x27   :  { %p1510_p4 = pnand %p1508_p3, %p1505_p2 }
  0x29   :  { %1513 = shalt.err (!%p1510_p4)
}
  0x2a   :  { %s1514_s20 = scalar_lea.vmem %s41_s11, 4096  ;;  %p1519_p6 = scmp.lt.s32.totalorder %s41_s11, %s41_s11 }
  0x2b   :  { %p1515_p5 = scmp.ne.s32.totalorder %s41_s11, %s1514_s20  ;;  %p1520_p7 = scmp.lt.s32.totalorder %s1514_s20, %s1514_s20 }
  0x2d   :  { %p1521_p8 = por %p1520_p7, %p1519_p6 }
  0x2f   :  { %p1522_p9 = pnand %p1521_p8, %p1515_p5 }
  0x31   :  { %1525 = shalt.err (!%p1522_p9)
}
  0x32   :  { %s1559_s0 = smov 128   ;;  %s1560_s15 = smov 8  }
  0x33   :  { %46 = dma.hbm_to_vmem [thread:$0]  %s1649_s2, 4096, %s41_s11, [#allocation6], %s1559_s0, %s1559_s0, %s1560_s15  }
  0x34   :  { %1548 = dma.done.wait [#allocation3], 768  }
  0x35   :  { %1549 = vsyncadd [#allocation3], 4294966528 }
  0x36   :  { %1550 = dma.done.wait [#allocation6], 16896  }
  0x37   :  { %1551 = vsyncadd [#allocation6], 4294950400  ;;  %v1294_v0 = vld [vmem:[#allocation5 + $0x4] ss:$16 sps:$4 sm:$0xff]   ;;  %v1296_v1 = vld [vmem:[#allocation5 + $0xc] ss:$16 sps:$4 sm:$0xff]  }
  0x38   :  { %702 = vmatprep.subr.bf16.mxu0 %v1294_v0  ;;  %v1298_v2 = vld [vmem:[#allocation5] ss:$16 sps:$4 sm:$0xff]   ;;  %v1299_v3 = vld [vmem:[#allocation5 + $0x8] ss:$16 sps:$4 sm:$0xff]   ;;  %804 = vmatprep.subr.bf16.mxu1 %v1296_v1  ;;  %v1300_v4 = vld [vmem:[#allocation5 + $0x24] ss:$16 sps:$4 sm:$0xff]  }
  0x39   :  { %703 = vmatpush1.bf16.msra.mxu0 %v1298_v2  ;;  %805 = vmatpush1.bf16.msra.mxu1 %v1299_v3  ;;  %v1302_v5 = vld [vmem:[#allocation5 + $0x2c] ss:$16 sps:$4 sm:$0xff]   ;;  %v1304_v6 = vld [vmem:[#allocation5 + $0x20] ss:$16 sps:$4 sm:$0xff]   ;;  %v1305_v7 = vld [vmem:[#allocation5 + $0x28] ss:$16 sps:$4 sm:$0xff]  }
  0x3a   :  { %704 = vmatprep.subr.bf16.mxu0 %v1300_v4  ;;  %806 = vmatprep.subr.bf16.mxu1 %v1302_v5  ;;  %v1306_v8 = vld [vmem:[#allocation5 + $0x44] ss:$16 sps:$4 sm:$0xff]   ;;  %v1308_v9 = vld [vmem:[#allocation5 + $0x4c] ss:$16 sps:$4 sm:$0xff]   ;;  %v1310_v10 = vld [vmem:[#allocation5 + $0x40] ss:$16 sps:$4 sm:$0xff]  }
  0x3b   :  { %v1311_v11 = vld [vmem:[#allocation5 + $0x48] ss:$16 sps:$4 sm:$0xff]   ;;  %v1312_v12 = vld [vmem:[#allocation5 + $0x64] ss:$16 sps:$4 sm:$0xff]   ;;  %v1314_v13 = vld [vmem:[#allocation5 + $0x6c] ss:$16 sps:$4 sm:$0xff]  }
  0x3c   :  { %v1316_v14 = vld [vmem:[#allocation5 + $0x60] ss:$16 sps:$4 sm:$0xff]   ;;  %v1317_v15 = vld [vmem:[#allocation5 + $0x68] ss:$16 sps:$4 sm:$0xff]   ;;  %v1318_v16 = vld [vmem:[#allocation5 + $0x84] ss:$16 sps:$4 sm:$0xff]  }
  0x3d   :  { %705 = vmatpush1.bf16.msra.mxu0 %v1304_v6  ;;  %807 = vmatpush1.bf16.msra.mxu1 %v1305_v7  ;;  %v1320_v17 = vld [vmem:[#allocation5 + $0x8c] ss:$16 sps:$4 sm:$0xff]   ;;  %v1322_v18 = vld [vmem:[#allocation5 + $0x80] ss:$16 sps:$4 sm:$0xff]   ;;  %v1323_v19 = vld [vmem:[#allocation5 + $0x88] ss:$16 sps:$4 sm:$0xff]  }
  0x3e   :  { %706 = vmatprep.subr.bf16.mxu0 %v1306_v8  ;;  %808 = vmatprep.subr.bf16.mxu1 %v1308_v9  ;;  %v1324_v20 = vld [vmem:[#allocation5 + $0xa4] ss:$16 sps:$4 sm:$0xff]   ;;  %v1326_v21 = vld [vmem:[#allocation5 + $0xac] ss:$16 sps:$4 sm:$0xff]   ;;  %v1328_v22 = vld [vmem:[#allocation5 + $0xa0] ss:$16 sps:$4 sm:$0xff]  }
  0x3f   :  { %v1329_v23 = vld [vmem:[#allocation5 + $0xa8] ss:$16 sps:$4 sm:$0xff]   ;;  %v1330_v24 = vld [vmem:[#allocation5 + $0xc4] ss:$16 sps:$4 sm:$0xff]   ;;  %v1332_v25 = vld [vmem:[#allocation5 + $0xcc] ss:$16 sps:$4 sm:$0xff]  }
  0x40   :  { %v1334_v26 = vld [vmem:[#allocation5 + $0xc0] ss:$16 sps:$4 sm:$0xff]   ;;  %v1335_v27 = vld [vmem:[#allocation5 + $0xc8] ss:$16 sps:$4 sm:$0xff]   ;;  %v1336_v28 = vld [vmem:[#allocation5 + $0xe4] ss:$16 sps:$4 sm:$0xff]  }
  0x41   :  { %707 = vmatpush1.bf16.msra.mxu0 %v1310_v10  ;;  %809 = vmatpush1.bf16.msra.mxu1 %v1311_v11  ;;  %v1338_v29 = vld [vmem:[#allocation5 + $0xec] ss:$16 sps:$4 sm:$0xff]   ;;  %v1340_v30 = vld [vmem:[#allocation5 + $0xe0] ss:$16 sps:$4 sm:$0xff]   ;;  %v1341_v31 = vld [vmem:[#allocation5 + $0xe8] ss:$16 sps:$4 sm:$0xff]  }
  0x42   :  { %708 = vmatprep.subr.bf16.mxu0 %v1312_v12  ;;  %810 = vmatprep.subr.bf16.mxu1 %v1314_v13  ;;  %v1342_v32 = vld [vmem:[#allocation5 + $0x104] ss:$16 sps:$4 sm:$0xff]   ;;  %v1344_v33 = vld [vmem:[#allocation5 + $0x10c] ss:$16 sps:$4 sm:$0xff]   ;;  %v1346_v34 = vld [vmem:[#allocation5 + $0x100] ss:$16 sps:$4 sm:$0xff]  }
  0x43   :  { %v1347_v35 = vld [vmem:[#allocation5 + $0x108] ss:$16 sps:$4 sm:$0xff]   ;;  %v1348_v36 = vld [vmem:[#allocation5 + $0x124] ss:$16 sps:$4 sm:$0xff]   ;;  %v1350_v37 = vld [vmem:[#allocation5 + $0x12c] ss:$16 sps:$4 sm:$0xff]  }
  0x44   :  { %v1352_v38 = vld [vmem:[#allocation5 + $0x120] ss:$16 sps:$4 sm:$0xff]   ;;  %v1353_v39 = vld [vmem:[#allocation5 + $0x128] ss:$16 sps:$4 sm:$0xff]   ;;  %v1354_v40 = vld [vmem:[#allocation5 + $0x144] ss:$16 sps:$4 sm:$0xff]  }
  0x45   :  { %709 = vmatpush1.bf16.msra.mxu0 %v1316_v14  ;;  %811 = vmatpush1.bf16.msra.mxu1 %v1317_v15  ;;  %v1356_v41 = vld [vmem:[#allocation5 + $0x14c] ss:$16 sps:$4 sm:$0xff]   ;;  %v1358_v42 = vld [vmem:[#allocation5 + $0x140] ss:$16 sps:$4 sm:$0xff]   ;;  %v1359_v43 = vld [vmem:[#allocation5 + $0x148] ss:$16 sps:$4 sm:$0xff]  }
  0x46   :  { %710 = vmatprep.subr.bf16.mxu0 %v1318_v16  ;;  %812 = vmatprep.subr.bf16.mxu1 %v1320_v17  ;;  %v1360_v44 = vld [vmem:[#allocation5 + $0x164] ss:$16 sps:$4 sm:$0xff]   ;;  %v1362_v45 = vld [vmem:[#allocation5 + $0x16c] ss:$16 sps:$4 sm:$0xff]   ;;  %v1364_v46 = vld [vmem:[#allocation5 + $0x160] ss:$16 sps:$4 sm:$0xff]  }
  0x47   :  { %v1365_v47 = vld [vmem:[#allocation5 + $0x168] ss:$16 sps:$4 sm:$0xff]   ;;  %v1392_v48 = vld [vmem:[#allocation2 + $0x4] ss:$16 sps:$4 sm:$0xff]   ;;  %v1368_v50 = vld [vmem:[#allocation5 + $0x18c] ss:$16 sps:$4 sm:$0xff]  }
  0x48   :  { %v1366_v49 = vld [vmem:[#allocation5 + $0x184] ss:$16 sps:$4 sm:$0xff]   ;;  %734 = vmatprep.mubr.bf16.mxu0 %v1392_v48  ;;  %836 = vmatprep.mubr.bf16.mxu1 %v1392_v48  ;;  %v1370_v51 = vld [vmem:[#allocation5 + $0x180] ss:$16 sps:$4 sm:$0xff]   ;;  %v1371_v52 = vld [vmem:[#allocation5 + $0x188] ss:$16 sps:$4 sm:$0xff]  }
  0x49   :  { %711 = vmatpush1.bf16.msra.mxu0 %v1322_v18  ;;  %813 = vmatpush1.bf16.msra.mxu1 %v1323_v19  ;;  %v1372_v53 = vld [vmem:[#allocation5 + $0x1a4] ss:$16 sps:$4 sm:$0xff]   ;;  %v1374_v54 = vld [vmem:[#allocation5 + $0x1ac] ss:$16 sps:$4 sm:$0xff]   ;;  %v1376_v55 = vld [vmem:[#allocation5 + $0x1a0] ss:$16 sps:$4 sm:$0xff]  }
  0x4a   :  { %712 = vmatprep.subr.bf16.mxu0 %v1324_v20  ;;  %814 = vmatprep.subr.bf16.mxu1 %v1326_v21  ;;  %v1377_v56 = vld [vmem:[#allocation5 + $0x1a8] ss:$16 sps:$4 sm:$0xff]   ;;  %v1378_v57 = vld [vmem:[#allocation5 + $0x1c4] ss:$16 sps:$4 sm:$0xff]   ;;  %v1380_v58 = vld [vmem:[#allocation5 + $0x1cc] ss:$16 sps:$4 sm:$0xff]  }
  0x4b   :  { %v1382_v59 = vld [vmem:[#allocation5 + $0x1c0] ss:$16 sps:$4 sm:$0xff]   ;;  %v1383_v60 = vld [vmem:[#allocation5 + $0x1c8] ss:$16 sps:$4 sm:$0xff]   ;;  %v1384_v61 = vld [vmem:[#allocation5 + $0x1e4] ss:$16 sps:$4 sm:$0xff]  }
  0x4c   :  { %v1386_v62 = vld [vmem:[#allocation5 + $0x1ec] ss:$16 sps:$4 sm:$0xff]   ;;  %v1388_v63 = vld [vmem:[#allocation5 + $0x1e0] ss:$16 sps:$4 sm:$0xff]   ;;  %v1389_v0 = vld [vmem:[#allocation5 + $0x1e8] ss:$16 sps:$4 sm:$0xff]  }
  0x4d   :  { %713 = vmatpush1.bf16.msra.mxu0 %v1328_v22  ;;  %815 = vmatpush1.bf16.msra.mxu1 %v1329_v23  ;;  %v1395_v1 = vld [vmem:[#allocation5 + $0x204] ss:$16 sps:$4 sm:$0xff]   ;;  %v1398_v2 = vld [vmem:[#allocation5 + $0x20c] ss:$16 sps:$4 sm:$0xff]   ;;  %v1390_v3 = vld [vmem:[#allocation2] ss:$16 sps:$4 sm:$0xff]  }
  0x4e   :  { %714 = vmatprep.subr.bf16.mxu0 %v1330_v24  ;;  %816 = vmatprep.subr.bf16.mxu1 %v1332_v25  ;;  %v1393_v4 = vld [vmem:[#allocation5 + $0x200] ss:$16 sps:$4 sm:$0xff]   ;;  %v1396_v6 = vld [vmem:[#allocation5 + $0x208] ss:$16 sps:$4 sm:$0xff]   ;;  %v1401_v7 = vld [vmem:[#allocation5 + $0x224] ss:$16 sps:$4 sm:$0xff]  }
  0x4f   :  { %v61_v5 = vld [vmem:[#allocation2 + $0x20] sm:$0xff]  ;;  %v1404_v8 = vld [vmem:[#allocation5 + $0x22c] ss:$16 sps:$4 sm:$0xff]   ;;  %v1402_v11 = vld [vmem:[#allocation5 + $0x228] ss:$16 sps:$4 sm:$0xff]   ;;  %vm695_vm0 = vcmask 130048  }
  0x50   :  { %v1074_v9 = vcombine.high %v61_v5, %v61_v5  ;;  %v1399_v10 = vld [vmem:[#allocation5 + $0x220] ss:$16 sps:$4 sm:$0xff]   ;;  %v1407_v12 = vld [vmem:[#allocation5 + $0x244] ss:$16 sps:$4 sm:$0xff]   ;;  %v1410_v13 = vld [vmem:[#allocation5 + $0x24c] ss:$16 sps:$4 sm:$0xff]   ;;  %v1073_v14 = vcombine.low %v61_v5, %v61_v5 }
  0x51   :  { %715 = vmatpush1.bf16.msra.mxu0 %v1334_v26  ;;  %817 = vmatpush1.bf16.msra.mxu1 %v1335_v27  ;;  %v1405_v15 = vld [vmem:[#allocation5 + $0x240] ss:$16 sps:$4 sm:$0xff]   ;;  %v1408_v16 = vld [vmem:[#allocation5 + $0x248] ss:$16 sps:$4 sm:$0xff]   ;;  %v1413_v17 = vld [vmem:[#allocation5 + $0x264] ss:$16 sps:$4 sm:$0xff]  }
  0x52   :  { %716 = vmatprep.subr.bf16.mxu0 %v1336_v28  ;;  %818 = vmatprep.subr.bf16.mxu1 %v1338_v29  ;;  %v1416_v18 = vld [vmem:[#allocation5 + $0x26c] ss:$16 sps:$4 sm:$0xff]   ;;  %v1411_v20 = vld [vmem:[#allocation5 + $0x260] ss:$16 sps:$4 sm:$0xff]   ;;  %v1414_v21 = vld [vmem:[#allocation5 + $0x268] ss:$16 sps:$4 sm:$0xff]  }
  0x53   :  { %v1451_v19 = vld [vmem:[#allocation2 + $0xc] ss:$16 sps:$4 sm:$0xff]   ;;  %v1419_v22 = vld [vmem:[#allocation5 + $0x284] ss:$16 sps:$4 sm:$0xff]   ;;  %v1417_v24 = vld [vmem:[#allocation5 + $0x280] ss:$16 sps:$4 sm:$0xff]  }
  0x54   :  { %v1422_v23 = vld [vmem:[#allocation5 + $0x28c] ss:$16 sps:$4 sm:$0xff]   ;;  %v1420_v25 = vld [vmem:[#allocation5 + $0x288] ss:$16 sps:$4 sm:$0xff]   ;;  %v1425_v26 = vld [vmem:[#allocation5 + $0x2a4] ss:$16 sps:$4 sm:$0xff]  }
  0x55   :  { %717 = vmatpush1.bf16.msra.mxu0 %v1340_v30  ;;  %819 = vmatpush1.bf16.msra.mxu1 %v1341_v31  ;;  %v1428_v27 = vld [vmem:[#allocation5 + $0x2ac] ss:$16 sps:$4 sm:$0xff]   ;;  %v1423_v28 = vld [vmem:[#allocation5 + $0x2a0] ss:$16 sps:$4 sm:$0xff]   ;;  %v1426_v29 = vld [vmem:[#allocation5 + $0x2a8] ss:$16 sps:$4 sm:$0xff]  }
  0x56   :  { %718 = vmatprep.subr.bf16.mxu0 %v1342_v32  ;;  %820 = vmatprep.subr.bf16.mxu1 %v1344_v33  ;;  %v1431_v30 = vld [vmem:[#allocation5 + $0x2c4] ss:$16 sps:$4 sm:$0xff]   ;;  %v1434_v31 = vld [vmem:[#allocation5 + $0x2cc] ss:$16 sps:$4 sm:$0xff]   ;;  %v1429_v32 = vld [vmem:[#allocation5 + $0x2c0] ss:$16 sps:$4 sm:$0xff]  }
  0x57   :  { %v1432_v33 = vld [vmem:[#allocation5 + $0x2c8] ss:$16 sps:$4 sm:$0xff]   ;;  %v948_v5 = vld [vmem:[#allocation7 + $0xc0] sm:$0xff]  ;;  %s1561_s2 = smov [#allocation8]  }
  0x58   :  { %v1449_v48 = vld [vmem:[#allocation2 + $0x8] ss:$16 sps:$4 sm:$0xff]   ;;  %s1056_s23 = sshll.u32 %s1561_s2, 4  ;;  %s1057_s23 = int_to_ptr.vmem [resolvable:$true] %s1056_s23 }
  0x59   :  { %719 = vmatpush1.bf16.msra.mxu0 %v1346_v34  ;;  %821 = vmatpush1.bf16.msra.mxu1 %v1347_v35  ;;  %v1439_v34 = vld [vmem:[#allocation5 + $0x2e4] ss:$16 sps:$4 sm:$0xff]   ;;  %v1442_v35 = vld [vmem:[#allocation5 + $0x2ec] ss:$16 sps:$4 sm:$0xff]   ;;  %s1526_s24 = scalar_lea.vmem %s1057_s23, 384  ;;  %p1531_p11 = scmp.lt.s32.totalorder %s1057_s23, %s1057_s23 }
  0x5a   :  { %720 = vmatprep.subr.bf16.mxu0 %v1348_v36  ;;  %822 = vmatprep.subr.bf16.mxu1 %v1350_v37  ;;  %v1437_v36 = vld [vmem:[#allocation5 + $0x2e0] ss:$16 sps:$4 sm:$0xff]   ;;  %v1440_v37 = vld [vmem:[#allocation5 + $0x2e8] ss:$16 sps:$4 sm:$0xff]   ;;  %p1527_p10 = scmp.ne.s32.totalorder %s1057_s23, %s1526_s24  ;;  %p1532_p12 = scmp.lt.s32.totalorder %s1526_s24, %s1526_s24 }
  0x5c   :  { %p1533_p13 = por %p1532_p12, %p1531_p11 }
  0x5d   :  { %721 = vmatpush1.bf16.msra.mxu0 %v1352_v38  ;;  %823 = vmatpush1.bf16.msra.mxu1 %v1353_v39  ;;  %v1445_v38 = vld [vmem:[#allocation5 + $0x304] ss:$16 sps:$4 sm:$0xff]   ;;  %v1448_v39 = vld [vmem:[#allocation5 + $0x30c] ss:$16 sps:$4 sm:$0xff]  }
  0x5e   :  { %722 = vmatprep.subr.bf16.mxu0 %v1354_v40  ;;  %824 = vmatprep.subr.bf16.mxu1 %v1356_v41  ;;  %v940_v40 = vld [vmem:[#allocation7 + $0x80] sm:$0xff]  ;;  %v941_v41 = vld [vmem:[#allocation7 + $0x88] sm:$0xff]  ;;  %p1534_p0 = pnand %p1533_p13, %p1527_p10 }
  0x61   :  { %723 = vmatpush1.bf16.msra.mxu0 %v1358_v42  ;;  %825 = vmatpush1.bf16.msra.mxu1 %v1359_v43  ;;  %v1443_v42 = vld [vmem:[#allocation5 + $0x300] ss:$16 sps:$4 sm:$0xff]   ;;  %v1446_v43 = vld [vmem:[#allocation5 + $0x308] ss:$16 sps:$4 sm:$0xff]  }
  0x62   :  { %724 = vmatprep.subr.bf16.mxu0 %v1360_v44  ;;  %826 = vmatprep.subr.bf16.mxu1 %v1362_v45  ;;  %v62_v44 = vld [vmem:[#allocation2 + $0x28] sm:$0xff]  ;;  %v1222_v45 = vpack.c.bf16 %v941_v41, %v940_v40 }
  0x65   :  { %725 = vmatpush1.bf16.msra.mxu0 %v1364_v46  ;;  %827 = vmatpush1.bf16.msra.mxu1 %v1365_v47  ;;  %v924_v46 = vld [vmem:[#allocation7] sm:$0xff]  ;;  %v925_v47 = vld [vmem:[#allocation7 + $0x8] sm:$0xff] }
  0x66   :  { %726 = vmatprep.subr.bf16.mxu0 %v1366_v49  ;;  %828 = vmatprep.subr.bf16.mxu1 %v1368_v50  ;;  %v942_v49 = vld [vmem:[#allocation7 + $0x90] sm:$0xff]  ;;  %v943_v50 = vld [vmem:[#allocation7 + $0x98] sm:$0xff] }
  0x69   :  { %727 = vmatpush1.bf16.msra.mxu0 %v1370_v51  ;;  %829 = vmatpush1.bf16.msra.mxu1 %v1371_v52  ;;  %v1076_v51 = vcombine.high %v62_v44, %v62_v44  ;;  %v1224_v52 = vpack.c.bf16 %v925_v47, %v924_v46 }
  0x6a   :  { %728 = vmatprep.subr.bf16.mxu0 %v1372_v53  ;;  %830 = vmatprep.subr.bf16.mxu1 %v1374_v54  ;;  %v1226_v53 = vpack.c.bf16 %v943_v50, %v942_v49  ;;  %v926_v54 = vld [vmem:[#allocation7 + $0x10] sm:$0xff] }
  0x6d   :  { %729 = vmatpush1.bf16.msra.mxu0 %v1376_v55  ;;  %831 = vmatpush1.bf16.msra.mxu1 %v1377_v56  ;;  %v927_v55 = vld [vmem:[#allocation7 + $0x18] sm:$0xff]  ;;  %v944_v56 = vld [vmem:[#allocation7 + $0xa0] sm:$0xff] }
  0x6e   :  { %730 = vmatprep.subr.bf16.mxu0 %v1378_v57  ;;  %832 = vmatprep.subr.bf16.mxu1 %v1380_v58  ;;  %v945_v57 = vld [vmem:[#allocation7 + $0xa8] sm:$0xff]  ;;  %v1228_v58 = vpack.c.bf16 %v927_v55, %v926_v54 }
  0x71   :  { %731 = vmatpush1.bf16.msra.mxu0 %v1382_v59  ;;  %833 = vmatpush1.bf16.msra.mxu1 %v1383_v60  ;;  %v1230_v59 = vpack.c.bf16 %v945_v57, %v944_v56  ;;  %v928_v60 = vld [vmem:[#allocation7 + $0x20] sm:$0xff] }
  0x72   :  { %732 = vmatprep.subr.bf16.mxu0 %v1384_v61  ;;  %834 = vmatprep.subr.bf16.mxu1 %v1386_v62  ;;  %v929_v61 = vld [vmem:[#allocation7 + $0x28] sm:$0xff]  ;;  %v1075_v62 = vcombine.low %v62_v44, %v62_v44 }
  0x75   :  { %733 = vmatpush1.bf16.msra.mxu0 %v1388_v63  ;;  %835 = vmatpush1.bf16.msra.mxu1 %v1389_v0  ;;  %v946_v63 = vld [vmem:[#allocation7 + $0xb0] sm:$0xff]  ;;  %v947_v0 = vld [vmem:[#allocation7 + $0xb8] sm:$0xff] }
  0x76   :  { %753 = vmatprep.subr.bf16.mxu0 %v1395_v1  ;;  %855 = vmatprep.subr.bf16.mxu1 %v1398_v2  ;;  %v1232_v1 = vpack.c.bf16 %v929_v61, %v928_v60  ;;  %v1234_v2 = vpack.c.bf16 %v947_v0, %v946_v63 }
  0x78   :  { %735 = vmatmul.mubr.bf16.vlgmr.msra.gmra.mrb[0].mxu0 %v1390_v3  ;;  %837 = vmatmul.mubr.bf16.vlgmr.msra.gmra.mrb[0].mxu1 %v1390_v3  ;;  %v930_v3 = vld [vmem:[#allocation7 + $0x30] sm:$0xff] }
  0x79   :  { %754 = vmatpush1.bf16.msra.mxu0 %v1393_v4  ;;  %856 = vmatpush1.bf16.msra.mxu1 %v1396_v6  ;;  %v931_v4 = vld [vmem:[#allocation7 + $0x38] sm:$0xff]  ;;  %v949_v6 = vld [vmem:[#allocation7 + $0xc8] sm:$0xff] }
  0x7a   :  { %755 = vmatprep.subr.bf16.mxu0 %v1401_v7  ;;  %857 = vmatprep.subr.bf16.mxu1 %v1404_v8  ;;  %v1236_v7 = vpack.c.bf16 %v931_v4, %v930_v3  ;;  %v1238_v8 = vpack.c.bf16 %v949_v6, %v948_v5 }
  0x7b   :  { %744 = vmatprep.mubr.bf16.mxu0 %v1074_v9  ;;  %846 = vmatprep.mubr.bf16.mxu1 %v1074_v9  ;;  %v932_v9 = vld [vmem:[#allocation7 + $0x40] sm:$0xff] }
  0x7d   :  { %756 = vmatpush1.bf16.msra.mxu0 %v1399_v10  ;;  %858 = vmatpush1.bf16.msra.mxu1 %v1402_v11  ;;  %v933_v10 = vld [vmem:[#allocation7 + $0x48] sm:$0xff]  ;;  %v950_v11 = vld [vmem:[#allocation7 + $0xd0] sm:$0xff] }
  0x7e   :  { %757 = vmatprep.subr.bf16.mxu0 %v1407_v12  ;;  %859 = vmatprep.subr.bf16.mxu1 %v1410_v13  ;;  %v951_v12 = vld [vmem:[#allocation7 + $0xd8] sm:$0xff]  ;;  %v1240_v13 = vpack.c.bf16 %v933_v10, %v932_v9 }
  0x80   :  { %745 = vmatmul.mubr.bf16.gmra.mrb[4].mxu0 %v1073_v14  ;;  %847 = vmatmul.mubr.bf16.gmra.mrb[4].mxu1 %v1073_v14  ;;  %v1242_v14 = vpack.c.bf16 %v951_v12, %v950_v11 }
  0x81   :  { %758 = vmatpush1.bf16.msra.mxu0 %v1405_v15  ;;  %860 = vmatpush1.bf16.msra.mxu1 %v1408_v16  ;;  %v934_v15 = vld [vmem:[#allocation7 + $0x50] sm:$0xff]  ;;  %v935_v16 = vld [vmem:[#allocation7 + $0x58] sm:$0xff] }
  0x82   :  { %759 = vmatprep.subr.bf16.mxu0 %v1413_v17  ;;  %861 = vmatprep.subr.bf16.mxu1 %v1416_v18  ;;  %v952_v17 = vld [vmem:[#allocation7 + $0xe0] sm:$0xff]  ;;  %v953_v18 = vld [vmem:[#allocation7 + $0xe8] sm:$0xff] }
  0x83   :  { %1177 = vmatprep.mubr.msk.bf16.mxu0 %vm695_vm0, %v1451_v19  ;;  %1179 = vmatprep.mubr.msk.bf16.mxu1 %vm695_vm0, %v1451_v19  ;;  %v1244_v19 = vpack.c.bf16 %v935_v16, %v934_v15 }
  0x85   :  { %760 = vmatpush1.bf16.msra.mxu0 %v1411_v20  ;;  %862 = vmatpush1.bf16.msra.mxu1 %v1414_v21  ;;  %v1246_v20 = vpack.c.bf16 %v953_v18, %v952_v17  ;;  %v936_v21 = vld [vmem:[#allocation7 + $0x60] sm:$0xff] }
  0x86   :  { %761 = vmatprep.subr.bf16.mxu0 %v1419_v22  ;;  %863 = vmatprep.subr.bf16.mxu1 %v1422_v23  ;;  %v937_v22 = vld [vmem:[#allocation7 + $0x68] sm:$0xff] }
  0x87   :  { %v1248_v23 = vpack.c.bf16 %v937_v22, %v936_v21 }
  0x89   :  { %762 = vmatpush1.bf16.msra.mxu0 %v1417_v24  ;;  %864 = vmatpush1.bf16.msra.mxu1 %v1420_v25  ;;  %v954_v24 = vld [vmem:[#allocation7 + $0xf0] sm:$0xff]  ;;  %v955_v25 = vld [vmem:[#allocation7 + $0xf8] sm:$0xff] }
  0x8a   :  { %763 = vmatprep.subr.bf16.mxu0 %v1425_v26  ;;  %865 = vmatprep.subr.bf16.mxu1 %v1428_v27  ;;  %v1250_v26 = vpack.c.bf16 %v955_v25, %v954_v24  ;;  %v938_v27 = vld [vmem:[#allocation7 + $0x70] sm:$0xff] }
  0x8d   :  { %764 = vmatpush1.bf16.msra.mxu0 %v1423_v28  ;;  %866 = vmatpush1.bf16.msra.mxu1 %v1426_v29  ;;  %v939_v28 = vld [vmem:[#allocation7 + $0x78] sm:$0xff] }
  0x8e   :  { %765 = vmatprep.subr.bf16.mxu0 %v1431_v30  ;;  %867 = vmatprep.subr.bf16.mxu1 %v1434_v31  ;;  %v1252_v29 = vpack.c.bf16 %v939_v28, %v938_v27 }
  0x91   :  { %766 = vmatpush1.bf16.msra.mxu0 %v1429_v32  ;;  %868 = vmatpush1.bf16.msra.mxu1 %v1432_v33 }
  0x92   :  { %767 = vmatprep.subr.bf16.mxu0 %v1439_v34  ;;  %869 = vmatprep.subr.bf16.mxu1 %v1442_v35 }
  0x95   :  { %768 = vmatpush1.bf16.msra.mxu0 %v1437_v36  ;;  %870 = vmatpush1.bf16.msra.mxu1 %v1440_v37 }
  0x96   :  { %769 = vmatprep.subr.bf16.mxu0 %v1445_v38  ;;  %871 = vmatprep.subr.bf16.mxu1 %v1448_v39 }
  0x99   :  { %770 = vmatpush1.bf16.msra.mxu0 %v1443_v42  ;;  %872 = vmatpush1.bf16.msra.mxu1 %v1446_v43 }
  0x9a   :  { %1223 = vmatprep.subr.bf16.mxu0 %v1222_v45  ;;  %1254 = vmatprep.subr.bf16.mxu1 %v1222_v45 }
  0x9c   :  { %786 = vmatmul.mubr.bf16.vlgmr.msra.gmra.mrb[0].mxu0 %v1449_v48  ;;  %888 = vmatmul.mubr.bf16.vlgmr.msra.gmra.mrb[0].mxu1 %v1449_v48 }
  0x9d   :  { %1178 = vmatprep.mubr.msk.bf16.mxu0 %vm695_vm0, %v1076_v51  ;;  %1180 = vmatprep.mubr.msk.bf16.mxu1 %vm695_vm0, %v1076_v51 }
  0x9e   :  { %1225 = vmatpush3.bf16.msra.mxu0 %v1224_v52  ;;  %1262 = vmatpush3.bf16.msra.mxu1 %v1224_v52 }
  0x9f   :  { %1227 = vmatprep.subr.bf16.mxu0 %v1226_v53  ;;  %1255 = vmatprep.subr.bf16.mxu1 %v1226_v53 }
  0xa2   :  { %1229 = vmatpush3.bf16.msra.mxu0 %v1228_v58  ;;  %1263 = vmatpush3.bf16.msra.mxu1 %v1228_v58 }
  0xa3   :  { %1231 = vmatprep.subr.bf16.mxu0 %v1230_v59  ;;  %1256 = vmatprep.subr.bf16.mxu1 %v1230_v59 }
  0xa4   :  { %796 = vmatmul.mubr.bf16.gmra.mrb[4].mxu0 %v1075_v62  ;;  %898 = vmatmul.mubr.bf16.gmra.mrb[4].mxu1 %v1075_v62 }
  0xa6   :  { %1233 = vmatpush3.bf16.msra.mxu0 %v1232_v1  ;;  %1264 = vmatpush3.bf16.msra.mxu1 %v1232_v1 }
  0xa7   :  { %1235 = vmatprep.subr.bf16.mxu0 %v1234_v2  ;;  %1257 = vmatprep.subr.bf16.mxu1 %v1234_v2 }
  0xaa   :  { %1237 = vmatpush3.bf16.msra.mxu0 %v1236_v7  ;;  %1265 = vmatpush3.bf16.msra.mxu1 %v1236_v7 }
  0xab   :  { %1239 = vmatprep.subr.bf16.mxu0 %v1238_v8  ;;  %1258 = vmatprep.subr.bf16.mxu1 %v1238_v8 }
  0xae   :  { %1241 = vmatpush3.bf16.msra.mxu0 %v1240_v13  ;;  %1266 = vmatpush3.bf16.msra.mxu1 %v1240_v13 }
  0xaf   :  { %1243 = vmatprep.subr.bf16.mxu0 %v1242_v14  ;;  %1259 = vmatprep.subr.bf16.mxu1 %v1242_v14 }
  0xb2   :  { %1245 = vmatpush3.bf16.msra.mxu0 %v1244_v19  ;;  %1267 = vmatpush3.bf16.msra.mxu1 %v1244_v19 }
  0xb3   :  { %1247 = vmatprep.subr.bf16.mxu0 %v1246_v20  ;;  %1260 = vmatprep.subr.bf16.mxu1 %v1246_v20 }
  0xb6   :  { %1249 = vmatpush3.bf16.msra.mxu0 %v1248_v23  ;;  %1268 = vmatpush3.bf16.msra.mxu1 %v1248_v23 }
  0xb7   :  { %1251 = vmatprep.subr.bf16.mxu0 %v1250_v26  ;;  %1261 = vmatprep.subr.bf16.mxu1 %v1250_v26 }
  0xba   :  { %1253 = vmatpush3.bf16.msra.mxu0 %v1252_v29  ;;  %1269 = vmatpush3.bf16.msra.mxu1 %v1252_v29 }
 0x16f   :  { %v787_v30 = vpop.f32.mrb[0].mxu0  ;;  %v889_v31 = vpop.f32.mrb[0].mxu1 }
 0x170   :  { %v906_v32 = vmul.f32 %v787_v30, %v787_v30  ;;  %v912_v33 = vmul.f32 %v889_v31, %v889_v31  ;;  %v789_v34 = vpop.f32.mrb[1].mxu0  ;;  %v891_v35 = vpop.f32.mrb[1].mxu1 }
 0x171   :  { %v907_v36 = vmul.f32 %v789_v34, %v789_v34  ;;  %v913_v37 = vmul.f32 %v891_v35, %v891_v35  ;;  %v791_v38 = vpop.f32.mrb[2].mxu0  ;;  %v893_v39 = vpop.f32.mrb[2].mxu1 }
 0x172   :  { %v918_v40 = vadd.f32 %v912_v33, %v906_v32  ;;  %v908_v41 = vmul.f32 %v791_v38, %v791_v38  ;;  %v914_v42 = vmul.f32 %v893_v39, %v893_v39  ;;  %v793_v43 = vpop.f32.mrb[3].mxu0  ;;  %v895_v44 = vpop.f32.mrb[3].mxu1 }
 0x173   :  { %v919_v45 = vadd.f32 %v913_v37, %v907_v36  ;;  %v909_v46 = vmul.f32 %v793_v43, %v793_v43  ;;  %v915_v47 = vmul.f32 %v895_v44, %v895_v44 }
 0x174   :  { %v920_v48 = vadd.f32 %v914_v42, %v908_v41 }
 0x175   :  { %v921_v49 = vadd.f32 %v915_v47, %v909_v46  ;;  %1020 = vmatprep.mubr.f32.mxu0 %v919_v45 }
 0x176   :  { %1021 = vmatmul.mubr.f32.vlgmr.msra.gmra.mrb[8].mxu0 %v918_v40 }
 0x177   :  { %v797_v50 = vpop.f32.mrb[4].mxu0  ;;  %v899_v51 = vpop.f32.mrb[4].mxu1  ;;  %1025 = vmatprep.mubr.f32.mxu1 %v921_v49 }
 0x178   :  { %v910_v52 = vmul.f32 %v797_v50, %v797_v50  ;;  %v916_v53 = vmul.f32 %v899_v51, %v899_v51  ;;  %v799_v54 = vpop.f32.mrb[5].mxu0  ;;  %v901_v55 = vpop.f32.mrb[5].mxu1  ;;  %1026 = vmatmul.mubr.f32.vlgmr.msra.gmra.mrb[8].mxu1 %v920_v48 }
 0x179   :  { %v911_v56 = vmul.f32 %v799_v54, %v799_v54  ;;  %v917_v57 = vmul.f32 %v901_v55, %v901_v55  ;;  %v801_v58 = vpop.f32.mrb[6].mxu0  ;;  %v903_v59 = vpop.f32.mrb[6].mxu1 }
 0x17a   :  { %v922_v60 = vadd.f32 %v916_v53, %v910_v52  ;;  %v802_v61 = vpop.f32.mrb[7].mxu0  ;;  %v904_v62 = vpop.f32.mrb[7].mxu1 }
 0x17b   :  { %v923_v63 = vadd.f32 %v917_v57, %v911_v56 }
 0x17d   :  { %1030 = vmatprep.mubr.f32.mxu1 %v923_v63 }
 0x17e   :  { %1031 = vmatmul.mubr.f32.gmra.mrb[10].mxu1 %v922_v60 }
 0x249   :  { %v1213_v0 = vpop.f32.mrb[8].mxu0 }
 0x24a   :  { %v1214_v1 = vpop.f32.mrb[9].mxu0 }
 0x24b   :  { %v1215_v2 = vadd.f32 %v1214_v1, %v1213_v0  ;;  %v1216_v3 = vpop.f32.mrb[8].mxu1 }
 0x24c   :  { %v1217_v4 = vpop.f32.mrb[9].mxu1 }
 0x24d   :  { %v1036_v5 = vmax.f32 %v1215_v2, 1e-10  ;;  %v1218_v6 = vadd.f32 %v1217_v4, %v1216_v3 }
 0x24f   :  { %1454 = vlog2.f32 %v1036_v5  ;;  %v1037_v7 = vmax.f32 %v1218_v6, 1e-10 }
 0x251   :  { %1456 = vlog2.f32 %v1037_v7  ;;  %v1219_v8 = vpop.f32.mrb[10].mxu1 }
 0x252   :  { %v1220_v9 = vpop.f32.mrb[11].mxu1 }
 0x253   :  { %v1221_v10 = vadd.f32 %v1220_v9, %v1219_v8 }
 0x255   :  { %v1038_v11 = vmax.f32 %v1221_v10, 1e-10 }
 0x257   :  { %1458 = vlog2.f32 %v1038_v11 }
 0x259   :  { %v1455_v12 = vpop.eup %1454 }
 0x25a   :  { %v1040_v13 = vmul.f32 0.6931472, %v1455_v12 }
 0x25b   :  { %v1457_v14 = vpop.eup %1456 }
 0x25c   :  { %v1045_v15 = vmul.f32 4.3429446, %v1040_v13  ;;  %v1042_v16 = vmul.f32 0.6931472, %v1457_v14 }
 0x25e   :  { %1048 = vst [vmem:[#allocation8] sm:$0xff] %v1045_v15  ;;  %v1046_v17 = vmul.f32 4.3429446, %v1042_v16 }
 0x260   :  { %1049 = vst [vmem:[#allocation8 + $0x8] sm:$0xff] %v1046_v17 }
 0x261   :  { %v1459_v18 = vpop.eup %1458 }
 0x262   :  { %v1044_v19 = vmul.f32 0.6931472, %v1459_v18 }
 0x264   :  { %v1047_v20 = vmul.f32 4.3429446, %v1044_v19 }
 0x266   :  { %1050 = vst [vmem:[#allocation8 + $0x10] sm:$0xff] %v1047_v20 }
 0x267   :  { %1537 = shalt.err (!%p1534_p0)
}
 0x268   :  { %s1538_s27 = scalar_lea.hbm %s1650_s3, 384 }
 0x269   :  { %p1539_p1 = scmp.ne.s32.totalorder %s1650_s3, %s1538_s27  ;;  %p1542_p2 = scmp.lt.u32.totalorder %s1538_s27, %s1650_s3 }
 0x26b   :  { %p1544_p3 = pnand %p1542_p2, %p1539_p1 }
 0x26d   :  { %1547 = shalt.err (!%p1544_p3)
}
 0x26e   :  { %1062 = dma.vmem_to_hbm [thread:$0]  %s1057_s23, 384, %s1650_s3, [#allocation4], %s1559_s0, %s1559_s0, %s1560_s15  }
 0x26f   :  { %1552 = dma.done.wait [#allocation4], 384  }
 0x270   :  { %1553 = vsyncadd [#allocation4], 4294966912 }
 0x271   :  { %1066 = vsyncpa [#allocation3], 1 }
 0x272   :  { %1067 = vsyncpa [#allocation6], 1 }
 0x273   :  { %1068 = vsyncpa [#allocation4], 1 }

</bundles_post_ra>
